<compile_context>
chip_gen: v7x
topology: tpu7x:2x2x1
jax: 0.10.0
libtpu: 0.0.40
codegen_flags: <defaults>
</compile_context>

<pallas_src>
import functools

import jax
import jax.numpy as jnp
from jax.experimental import pallas as pl
from jax.experimental.pallas import tpu as pltpu


def _round_up(x, m):
    return (x + m - 1) // m * m


# Tile preferences (multiples of 128 lanes / 8 sublanes; blocks stay well under
# the 32 MiB default scoped-VMEM limit on all of v5e/v6e/v7x).
_TM_PREF = 512
_TN_PREF = 256
_TK_PREF = 1024
_VMEM_LIMIT = 48 * 1024 * 1024


# ----------------------------------------------------------------------------
# Tiled matmul kernel (bias / bias+residual epilogue)
# ----------------------------------------------------------------------------

def _mm_kernel(a_ref, b_ref, bias_ref, o_ref, acc_ref):
    @pl.when(pl.program_id(2) == 0)
    def _init():
        acc_ref[...] = jnp.zeros_like(acc_ref)

    acc_ref[...] += jnp.dot(a_ref[...].astype(jnp.bfloat16),
                            b_ref[...].astype(jnp.bfloat16),
                            preferred_element_type=jnp.float32)

    @pl.when(pl.program_id(2) == pl.num_programs(2) - 1)
    def _fin():
        o_ref[...] = acc_ref[...] + bias_ref[...]


def _mm_res_kernel(a_ref, b_ref, bias_ref, r_ref, o_ref, acc_ref):
    @pl.when(pl.program_id(2) == 0)
    def _init():
        acc_ref[...] = jnp.zeros_like(acc_ref)

    acc_ref[...] += jnp.dot(a_ref[...].astype(jnp.bfloat16),
                            b_ref[...].astype(jnp.bfloat16),
                            preferred_element_type=jnp.float32)

    @pl.when(pl.program_id(2) == pl.num_programs(2) - 1)
    def _fin():
        o_ref[...] = acc_ref[...] + bias_ref[...] + r_ref[...]


def _dim_tile(size, pref):
    """Largest legal single tile for a dim, or (pref, padded size) if it must tile."""
    if size <= pref:
        return size, size
    return pref, _round_up(size, pref)


def pallas_matmul(a, b, bias, residual=None):
    """out = a @ b + bias (+ residual).   a:(M,K)  b:(K,N)  bias:(N,)  res:(M,N).

    MXU operands are cast to bf16 inside the kernel; accumulation is f32 in a
    VMEM scratch block with a K-reduction grid axis.
    """
    M, K = a.shape
    K2, N = b.shape
    assert K == K2
    tm, Mp = _dim_tile(M, _TM_PREF)
    tn, Np = _dim_tile(N, _TN_PREF)
    tk, Kp = _dim_tile(K, _TK_PREF)

    if (Mp, Kp) != (M, K):
        a = jnp.pad(a, ((0, Mp - M), (0, Kp - K)))
    bm = b.astype(jnp.float32)
    if (Kp, Np) != (K, N):
        bm = jnp.pad(bm, ((0, Kp - K), (0, Np - N)))
    bias_m = bias.astype(jnp.float32).reshape(1, N)
    if Np != N:
        bias_m = jnp.pad(bias_m, ((0, 0), (0, Np - N)))

    grid = (Mp // tm, Np // tn, Kp // tk)
    in_specs = [pl.BlockSpec((tm, tk), lambda i, j, k: (i, k)),
                pl.BlockSpec((tk, tn), lambda i, j, k: (k, j)),
                pl.BlockSpec((1, tn), lambda i, j, k: (0, j))]
    operands = [a, bm, bias_m]
    kernel = _mm_kernel
    if residual is not None:
        r = residual.astype(jnp.float32)
        if (Mp, Np) != (M, N):
            r = jnp.pad(r, ((0, Mp - M), (0, Np - N)))
        in_specs.append(pl.BlockSpec((tm, tn), lambda i, j, k: (i, j)))
        operands.append(r)
        kernel = _mm_res_kernel

    out = pl.pallas_call(
        kernel,
        out_shape=jax.ShapeDtypeStruct((Mp, Np), jnp.float32),
        grid=grid,
        in_specs=in_specs,
        out_specs=pl.BlockSpec((tm, tn), lambda i, j, k: (i, j)),
        scratch_shapes=[pltpu.VMEM((tm, tn), jnp.float32)],
        compiler_params=pltpu.CompilerParams(
            dimension_semantics=("parallel", "parallel", "arbitrary"),
            vmem_limit_bytes=_VMEM_LIMIT),
    )(*operands)
    if (Mp, Np) != (M, N):
        out = out[:M, :N]
    return out


# ----------------------------------------------------------------------------
# GroupNorm (+ optional SiLU) kernel
# ----------------------------------------------------------------------------

def _gn_kernel(x_ref, gmat_ref, gamma_ref, beta_ref, o_ref, *, eps, silu):
    # x: (HW, C) for one sample.  Group stats via per-channel sums broadcast
    # within groups by a small matmul against `gmat` (lane friendly).
    x = x_ref[0]
    s = jnp.sum(x, axis=0, keepdims=True)                               # (1, C)
    mean = jnp.dot(s, gmat_ref[...], preferred_element_type=jnp.float32)
    xc = x - mean                                    # centered: stable variance
    ss = jnp.sum(xc * xc, axis=0, keepdims=True)
    var = jnp.dot(ss, gmat_ref[...], preferred_element_type=jnp.float32)
    var = jnp.maximum(var, 0.0)
    y = xc * jax.lax.rsqrt(var + eps) * gamma_ref[...] + beta_ref[...]
    if silu:
        y = y * jax.nn.sigmoid(y)                                # nonlinearity()
    o_ref[0] = y


def pallas_groupnorm(x_nhwc, gamma, beta, num_groups=32, eps=1e-6, silu=False):
    """GroupNorm(32, C, eps=1e-6, affine=True) (+ optional swish), per sample."""
    B, H, W, C = x_nhwc.shape
    HW = H * W
    x = x_nhwc.reshape(B, HW, C).astype(jnp.float32)
    cg = C // num_groups
    gid = jnp.arange(C) // cg
    gmat = (gid[:, None] == gid[None, :]).astype(jnp.float32) / float(HW * cg)
    gamma = gamma.reshape(1, C).astype(jnp.float32)
    beta = beta.reshape(1, C).astype(jnp.float32)
    kernel = functools.partial(_gn_kernel, eps=eps, silu=silu)
    # TODO(synk): tile over HW with partial-sum scratch for resolutions where a
    # full (HW, C) slab no longer fits VMEM (v7x: 64 MiB).
    out = pl.pallas_call(
        kernel,
        out_shape=jax.ShapeDtypeStruct((B, HW, C), jnp.float32),
        grid=(B,),
        in_specs=[pl.BlockSpec((1, HW, C), lambda b: (b, 0, 0)),
                  pl.BlockSpec((C, C), lambda b: (0, 0)),
                  pl.BlockSpec((1, C), lambda b: (0, 0)),
                  pl.BlockSpec((1, C), lambda b: (0, 0))],
        out_specs=pl.BlockSpec((1, HW, C), lambda b: (b, 0, 0)),
        compiler_params=pltpu.CompilerParams(
            dimension_semantics=("parallel",)),
    )(x, gmat, gamma, beta)
    return out.reshape(B, H, W, C)


# ----------------------------------------------------------------------------
# Multi-head attention kernel (all heads of one sample per block)
# ----------------------------------------------------------------------------

def _attn_kernel(q_ref, k_ref, v_ref, o_ref, *, num_heads, scale):
    # Heads are separated with lane masks (iota compare) so no sub-128 lane
    # slicing and no HBM head split/merge transposes are needed.
    q = q_ref[0]                                                     # (N, C)
    k = k_ref[0]
    v = v_ref[0]
    n, c = q.shape
    d = c // num_heads
    head_of_col = jax.lax.broadcasted_iota(jnp.int32, (n, c), 1) // d
    acc = jnp.zeros((n, c), jnp.float32)
    for h in range(num_heads):
        m_h = head_of_col == h
        kh = jnp.where(m_h, k, 0.0)
        vh = jnp.where(m_h, v, 0.0)
        s = jax.lax.dot_general(q, kh, (((1,), (1,)), ((), ())),
                                preferred_element_type=jnp.float32) * scale
        mx = jnp.max(s, axis=-1, keepdims=True)
        p = jnp.exp(s - mx)
        l = jnp.sum(p, axis=-1, keepdims=True)
        pv = jnp.dot(p, vh, preferred_element_type=jnp.float32)
        acc = acc + pv * pl.reciprocal(l, approx=True)      # EUP reciprocal
    o_ref[0] = acc


def pallas_attention_mha(q, k, v, num_heads):
    """softmax(q_h k_h^T / sqrt(d)) v_h per head, heads merged.  q,k,v: (B,N,C)."""
    B, N, C = q.shape
    d = C // num_heads
    scale = 1.0 / float(d) ** 0.5
    kernel = functools.partial(_attn_kernel, num_heads=num_heads, scale=scale)
    spec = pl.BlockSpec((1, N, C), lambda b: (b, 0, 0))
    # TODO(synk): flash-style KV tiling (online softmax) for N >> 1024 so the
    # (N, N) score tile stays bounded on v7x VMEM.
    return pl.pallas_call(
        kernel,
        out_shape=jax.ShapeDtypeStruct((B, N, C), jnp.float32),
        grid=(B,),
        in_specs=[spec, spec, spec],
        out_specs=spec,
        compiler_params=pltpu.CompilerParams(
            dimension_semantics=("parallel",)),
    )(q.astype(jnp.float32), k.astype(jnp.float32), v.astype(jnp.float32))


# ----------------------------------------------------------------------------
# Conv / block helpers (bf16 im2col glue in JAX, matmul in Pallas)
# ----------------------------------------------------------------------------

def conv2d(x, w, b, stride=1, pad=((1, 1), (1, 1)), residual=None):
    """x: NHWC, w: (kh, kw, cin, cout).  Matches torch Conv2d semantics."""
    B, H, W, C = x.shape
    kh, kw, cin, cout = w.shape
    if kh == 1 and kw == 1 and stride == 1:
        out = pallas_matmul(
            x.reshape(B * H * W, cin), w.reshape(cin, cout), b,
            None if residual is None else residual.reshape(B * H * W, cout))
        return out.reshape(B, H, W, cout)
    # TODO(synk): fold the kh*kw tap accumulation into the matmul grid (element-
    # offset windows) to avoid materializing the im2col patches in HBM at all.
    xp = jnp.pad(x, ((0, 0), pad[0], pad[1], (0, 0))).astype(jnp.bfloat16)
    Hp, Wp = xp.shape[1], xp.shape[2]
    Ho = (Hp - kh) // stride + 1
    Wo = (Wp - kw) // stride + 1
    cols = [xp[:, i:i + stride * Ho:stride, j:j + stride * Wo:stride, :]
            for i in range(kh) for j in range(kw)]
    patches = jnp.concatenate(cols, axis=-1).reshape(B * Ho * Wo, kh * kw * cin)
    wm = w.reshape(kh * kw * cin, cout)
    res = None if residual is None else residual.reshape(B * Ho * Wo, cout)
    out = pallas_matmul(patches, wm, b, res)
    return out.reshape(B, Ho, Wo, cout)


def resnet_block(x, p):
    """ResnetBlock: GN+swish -> conv3x3 -> GN+swish -> (dropout=0) -> conv3x3,
    with 1x1 nin_shortcut when in_channels != out_channels; residual add fused
    into the final Pallas matmul epilogue."""
    h = pallas_groupnorm(x, p['norm1_g'], p['norm1_b'], silu=True)
    h = conv2d(h, p['conv1_w'], p['conv1_b'])
    h = pallas_groupnorm(h, p['norm2_g'], p['norm2_b'], silu=True)
    if 'nin_w' in p:
        sc = conv2d(x, p['nin_w'], p['nin_b'], pad=((0, 0), (0, 0)))
    else:
        sc = x
    return conv2d(h, p['conv2_w'], p['conv2_b'], residual=sc)


def attn_block(x, p, num_heads=8):
    """MemoryEfficientAttnBlock (no window partition at this resolution)."""
    B, H, W, C = x.shape
    hw = H * W
    h = pallas_groupnorm(x, p['norm_g'], p['norm_b'], silu=False)
    hf = h.reshape(B * hw, C)
    qkv = pallas_matmul(hf, p['qkv_w'], p['qkv_b'])          # fused q|k|v (M, 3C)
    q = qkv[:, :C].reshape(B, hw, C)
    k = qkv[:, C:2 * C].reshape(B, hw, C)
    v = qkv[:, 2 * C:].reshape(B, hw, C)
    o = pallas_attention_mha(q, k, v, num_heads).reshape(B * hw, C)
    o = pallas_matmul(o, p['proj_w'], p['proj_b'],
                      residual=x.reshape(B * hw, C))         # proj + x fused
    return o.reshape(B, H, W, C)


# ----------------------------------------------------------------------------
# Encoder (mode='2d', ch_mult=(1,2), num_res_blocks=1, out_z=True, double_z)
# ----------------------------------------------------------------------------

def encoder_forward(params, x_nchw):
    x = jnp.transpose(x_nchw, (0, 2, 3, 1))                      # NCHW -> NHWC
    h = conv2d(x, *params['conv_in'])                            # conv_in 3x3 p1
    # --- down level 0 ---
    h = resnet_block(h, params['down0_block0'])
    # Downsample(with_conv, '2d'): F.pad(x,(0,1,0,1)) then conv3x3 stride2 p0
    h = jnp.pad(h, ((0, 0), (0, 1), (0, 1), (0, 0)))
    h = conv2d(h, *params['down0_downsample'], stride=2, pad=((0, 0), (0, 0)))
    # --- down level 1 (last level: downsample = Identity) ---
    h = resnet_block(h, params['down1_block0'])
    # --- mid ---
    h = resnet_block(h, params['mid_block1'])
    h = attn_block(h, params['mid_attn'])
    h = resnet_block(h, params['mid_block2'])
    # --- head ---
    h = pallas_groupnorm(h, *params['norm_out'], silu=True)      # norm + swish
    h = conv2d(h, *params['conv_out'])                           # -> 2*z_channels
    return jnp.transpose(h, (0, 3, 1, 2))                        # NHWC -> NCHW
    # TODO(synk): 3d/causal3d conv modes and the window-attention branch of
    # MemoryEfficientAttnBlock are not exercised by this 2d config.


# ----------------------------------------------------------------------------
# Deterministic parameter init (shapes dictated by Encoder.__init__)
# ----------------------------------------------------------------------------

def init_params(key, *, in_channels=3, ch=32, ch_mult=(1, 2), z_channels=4,
                double_z=True):
    keys = iter(jax.random.split(key, 64))

    def conv_p(kh, kw, cin, cout):
        w = jax.random.normal(next(keys), (kh, kw, cin, cout), jnp.float32) * 0.05
        b = jax.random.normal(next(keys), (cout,), jnp.float32) * 0.01
        return w, b

    def norm_p(c):
        g = 1.0 + 0.01 * jax.random.normal(next(keys), (c,), jnp.float32)
        b = 0.01 * jax.random.normal(next(keys), (c,), jnp.float32)
        return g, b

    def resblock_p(cin, cout):
        p = {}
        p['norm1_g'], p['norm1_b'] = norm_p(cin)
        p['conv1_w'], p['conv1_b'] = conv_p(3, 3, cin, cout)
        p['norm2_g'], p['norm2_b'] = norm_p(cout)
        p['conv2_w'], p['conv2_b'] = conv_p(3, 3, cout, cout)
        if cin != cout:
            p['nin_w'], p['nin_b'] = conv_p(1, 1, cin, cout)
        return p

    c0 = ch * ch_mult[0]
    c1 = ch * ch_mult[1]
    params = {}
    params['conv_in'] = conv_p(3, 3, in_channels, ch)
    params['down0_block0'] = resblock_p(ch, c0)
    params['down0_downsample'] = conv_p(3, 3, c0, c0)
    params['down1_block0'] = resblock_p(c0, c1)
    params['mid_block1'] = resblock_p(c1, c1)
    ap = {}
    ap['norm_g'], ap['norm_b'] = norm_p(c1)
    qkv_ws, qkv_bs = [], []
    for _ in range(3):                                  # q, k, v 1x1 convs fused
        w, bb = conv_p(1, 1, c1, c1)
        qkv_ws.append(w.reshape(c1, c1))
        qkv_bs.append(bb)
    ap['qkv_w'] = jnp.concatenate(qkv_ws, axis=1)       # (C, 3C)
    ap['qkv_b'] = jnp.concatenate(qkv_bs, axis=0)       # (3C,)
    w, bb = conv_p(1, 1, c1, c1)
    ap['proj_w'] = w.reshape(c1, c1)
    ap['proj_b'] = bb
    params['mid_attn'] = ap
    params['mid_block2'] = resblock_p(c1, c1)
    params['norm_out'] = norm_p(c1)
    out_c = 2 * z_channels if double_z else z_channels
    params['conv_out'] = conv_p(3, 3, c1, out_c)
    return params


if __name__ == "__main__":
    key = jax.random.PRNGKey(0)
    pkey, xkey = jax.random.split(key)
    params = init_params(pkey)
    # NCHW input, matching the PyTorch module's convention.
    x = jax.random.normal(xkey, (2, 3, 16, 16), jnp.float32)
    out = encoder_forward(params, x)
    out = jax.block_until_ready(out)
    assert out.shape == (2, 8, 8, 8), out.shape   # (B, 2*z_channels, 8, 8)
    assert jnp.all(jnp.isfinite(out))
    print("KERNEL_OK")
</pallas_src>

<mosaic_0001>
module attributes {stable_mosaic.version = 11 : i64} {
  func.func @_mm_kernel(%arg0: i32, %arg1: i32, %arg2: i32, %arg3: memref<512x27xbf16, #tpu.memory_space<vmem>>, %arg4: memref<27x32xf32, #tpu.memory_space<vmem>>, %arg5: memref<1x32xf32, #tpu.memory_space<vmem>>, %arg6: memref<512x32xf32, #tpu.memory_space<vmem>>, %arg7: memref<512x32xf32, #tpu.memory_space<vmem>>) attributes {dimension_semantics = [#tpu.dimension_semantics<parallel>, #tpu.dimension_semantics<parallel>, #tpu.dimension_semantics<arbitrary>], iteration_bounds = array<i64: 1, 1, 1>, scalar_prefetch = 0 : i64, scratch_operands = 1 : i64, tpu.core_type = #tpu.core_type<tc>, window_params = [{transform_indices = @transform_0, window_bounds = array<i64: 512, 27>}, {transform_indices = @transform_1, window_bounds = array<i64: 27, 32>}, {transform_indices = @transform_2, window_bounds = array<i64: 1, 32>}, {transform_indices = @transform_3, window_bounds = array<i64: 512, 32>}]} {
    %c0_i32 = arith.constant 0 : i32
    %0 = arith.cmpi eq, %arg2, %c0_i32 : i32
    %1 = arith.extui %0 : i1 to i32
    %c0_i32_0 = arith.constant 0 : i32
    %2 = arith.cmpi ne, %1, %c0_i32_0 : i32
    scf.if %2 {
      %cst_10 = arith.constant 0.000000e+00 : f32
      %13 = vector.broadcast %cst_10 : f32 to vector<512x32xf32>
      %c0_11 = arith.constant 0 : index
      %c0_12 = arith.constant 0 : index
      %14 = vector.load %arg7[%c0_11, %c0_12] : memref<512x32xf32, #tpu.memory_space<vmem>>, vector<512x32xf32>
      tpu.vector_store %arg7[%c0_11, %c0_12], %13 {strides = array<i32>} : memref<512x32xf32, #tpu.memory_space<vmem>>, vector<512x32xf32>,
    } else {
    }
    %c0 = arith.constant 0 : index
    %c0_1 = arith.constant 0 : index
    %3 = vector.load %arg7[%c0, %c0_1] : memref<512x32xf32, #tpu.memory_space<vmem>>, vector<512x32xf32>
    %c0_2 = arith.constant 0 : index
    %c0_3 = arith.constant 0 : index
    %4 = vector.load %arg3[%c0_2, %c0_3] : memref<512x27xbf16, #tpu.memory_space<vmem>>, vector<512x27xbf16>
    %c0_4 = arith.constant 0 : index
    %c0_5 = arith.constant 0 : index
    %5 = vector.load %arg4[%c0_4, %c0_5] : memref<27x32xf32, #tpu.memory_space<vmem>>, vector<27x32xf32>
    %6 = arith.truncf %5 : vector<27x32xf32> to vector<27x32xbf16>
    %cst = arith.constant dense<0.000000e+00> : vector<512x32xf32>
    %7 = tpu.matmul %4, %6, %cst {dimension_numbers = #tpu.dot_dimension_numbers<[1], [0], [0], [1], [0, 0, 1, 1], [], []>} : vector<512x27xbf16>, vector<27x32xbf16>, vector<512x32xf32> -> vector<512x32xf32>
    %8 = arith.addf %3, %7 : vector<512x32xf32>
    %c0_6 = arith.constant 0 : index
    %c0_7 = arith.constant 0 : index
    %9 = vector.load %arg7[%c0_6, %c0_7] : memref<512x32xf32, #tpu.memory_space<vmem>>, vector<512x32xf32>
    tpu.vector_store %arg7[%c0_6, %c0_7], %8 {strides = array<i32>} : memref<512x32xf32, #tpu.memory_space<vmem>>, vector<512x32xf32>,
    %c0_i32_8 = arith.constant 0 : i32
    %10 = arith.cmpi eq, %arg2, %c0_i32_8 : i32
    %11 = arith.extui %10 : i1 to i32
    %c0_i32_9 = arith.constant 0 : i32
    %12 = arith.cmpi ne, %11, %c0_i32_9 : i32
    scf.if %12 {
      %c0_10 = arith.constant 0 : index
      %c0_11 = arith.constant 0 : index
      %13 = vector.load %arg7[%c0_10, %c0_11] : memref<512x32xf32, #tpu.memory_space<vmem>>, vector<512x32xf32>
      %c0_12 = arith.constant 0 : index
      %c0_13 = arith.constant 0 : index
      %14 = vector.load %arg5[%c0_12, %c0_13] : memref<1x32xf32, #tpu.memory_space<vmem>>, vector<1x32xf32>
      %15 = vector.broadcast %14 : vector<1x32xf32> to vector<512x32xf32>
      %16 = arith.addf %13, %15 : vector<512x32xf32>
      %c0_14 = arith.constant 0 : index
      %c0_15 = arith.constant 0 : index
      %17 = vector.load %arg6[%c0_14, %c0_15] : memref<512x32xf32, #tpu.memory_space<vmem>>, vector<512x32xf32>
      tpu.vector_store %arg6[%c0_14, %c0_15], %16 {strides = array<i32>} : memref<512x32xf32, #tpu.memory_space<vmem>>, vector<512x32xf32>,
    } else {
    }
    return
  }
  func.func @transform_0(%arg0: i32, %arg1: i32, %arg2: i32) -> (i32, i32) {
    %c0_i32 = arith.constant 0 : i32
    return %arg0, %arg2 : i32, i32
  }
  func.func @transform_1(%arg0: i32, %arg1: i32, %arg2: i32) -> (i32, i32) {
    %c0_i32 = arith.constant 0 : i32
    return %arg2, %arg1 : i32, i32
  }
  func.func @transform_2(%arg0: i32, %arg1: i32, %arg2: i32) -> (i32, i32) {
    %c0_i32 = arith.constant 0 : i32
    %c0_i32_0 = arith.constant 0 : i32
    return %c0_i32, %arg1 : i32, i32
  }
  func.func @transform_3(%arg0: i32, %arg1: i32, %arg2: i32) -> (i32, i32) {
    %c0_i32 = arith.constant 0 : i32
    return %arg0, %arg1 : i32, i32
  }
}

</mosaic_0001>

<bundles_post_ra>
// kernel: tpu_custom_call.1
= control target key start
LH: loop header
LB: loop body
LE: loop exit
PB: predicated region body
PF: predicated region fallthrough
CT: control target
= control target key end

     0   :  { %vm475_vm0 = vcmask 1044480   ;;  %vm476_vm1 = vcmask 1045504   ;;  %vm378_vm2 = vcmask 220160   ;;  %v1311_v3 = vmov 65535   ;;  %s2008_s1 = inlined_call_operand.vmem [shape: f32[27,32], index: 1, kind: input, shape index: {}]   ;;  %s2009_s0 = inlined_call_operand.vmem [shape: bf16[512,27], index: 0, kind: input, shape index: {}]   ;;  %s2010_s2 = inlined_call_operand.vmem [shape: f32[1,32], index: 2, kind: input, shape index: {}]   ;;  %s2011_s3 = inlined_call_operand.vmem [shape: f32[512,32], index: 3, kind: output, shape index: {}]  }
   0x1   :  { %v212_v0 = vld [vmem:[%s2008_s1] sm:$0xff]  ;;  %v213_v1 = vld [vmem:[%s2008_s1 + $0x8] sm:$0xff]  ;;  %v1342_v2 = vld [vmem:[%s2008_s1 + $0x10] sm:$0xff]  ;;  %v477_v4 = vsel %vm475_vm0, 4294967295, %v1311_v3  ;;  %vm19_vm3 = vcmask 261120   ;;  %v1312_v9 = vmov 0.0  }
   0x2   :  { %v1344_v5 = vpack.c.bf16 %v213_v1, %v212_v0  ;;  %v1349_v6 = vld [vmem:[%s2008_s1 + $0x18] sm:$0x7]  ;;  %v1351_v7 = vsel %vm476_vm1, %v477_v4, 0  ;;  %v1356_v8 = vld [vmem:[%s2009_s0] sm:$0xff]   ;;  %22 = vst.msk [vmem:[#allocation2 + $0x10] sm:$0xff] %vm19_vm3, %v1312_v9  ;;  %20 = vst.msk [vmem:[#allocation2] sm:$0xff] %vm19_vm3, %v1312_v9 }
   0x3   :  { %21 = vst.msk [vmem:[#allocation2 + $0x8] sm:$0xff] %vm19_vm3, %v1312_v9  ;;  %23 = vst.msk [vmem:[#allocation2 + $0x18] sm:$0xff] %vm19_vm3, %v1312_v9  ;;  %v217_v10 = vpack.c.bf16 %v1349_v6, %v1342_v2  ;;  %v1280_v11 = vld [vmem:[%s2009_s0 + $0x80] sm:$0xff]   ;;  %1209 = vmatprep.mubr.msk.bf16.mxu0 %vm378_vm2, %v1356_v8  ;;  %v1281_v13 = vld [vmem:[%s2009_s0 + $0x8] sm:$0xff]  }
   0x4   :  { %24 = vst.msk [vmem:[#allocation2 + $0x20] sm:$0xff] %vm19_vm3, %v1312_v9  ;;  %25 = vst.msk [vmem:[#allocation2 + $0x28] sm:$0xff] %vm19_vm3, %v1312_v9  ;;  %1205 = vmatprep.subr.bf16.mxu0 %v1344_v5  ;;  %1273 = vmatprep.subr.bf16.mxu1 %v1344_v5  ;;  %v1282_v14 = vld [vmem:[%s2009_s0 + $0x88] sm:$0xff]   ;;  %v1283_v15 = vld [vmem:[%s2009_s0 + $0x10] sm:$0xff]  }
   0x5   :  { %26 = vst.msk [vmem:[#allocation2 + $0x30] sm:$0xff] %vm19_vm3, %v1312_v9  ;;  %27 = vst.msk [vmem:[#allocation2 + $0x38] sm:$0xff] %vm19_vm3, %v1312_v9  ;;  %1206 = vmatpush3.bf16.msra.mxu0 %v1344_v5  ;;  %1275 = vmatpush3.bf16.msra.mxu1 %v1344_v5  ;;  %v480_v12 = vand.u32 %v1351_v7, %v217_v10  ;;  %v1284_v16 = vld [vmem:[%s2009_s0 + $0x90] sm:$0xff]   ;;  %v1285_v17 = vld [vmem:[%s2009_s0 + $0x18] sm:$0xff]  }
   0x6   :  { %28 = vst.msk [vmem:[#allocation2 + $0x40] sm:$0xff] %vm19_vm3, %v1312_v9  ;;  %29 = vst.msk [vmem:[#allocation2 + $0x48] sm:$0xff] %vm19_vm3, %v1312_v9  ;;  %1241 = vmatprep.mubr.msk.bf16.mxu1 %vm378_vm2, %v1280_v11  ;;  %v1286_v18 = vld [vmem:[%s2009_s0 + $0x98] sm:$0xff]   ;;  %v1287_v19 = vld [vmem:[%s2009_s0 + $0x20] sm:$0xff]  }
   0x7   :  { %30 = vst.msk [vmem:[#allocation2 + $0x50] sm:$0xff] %vm19_vm3, %v1312_v9  ;;  %31 = vst.msk [vmem:[#allocation2 + $0x58] sm:$0xff] %vm19_vm3, %v1312_v9  ;;  %1207 = vmatprep.subr.bf16.mxu0 %v480_v12  ;;  %1274 = vmatprep.subr.bf16.mxu1 %v480_v12  ;;  %v1288_v20 = vld [vmem:[%s2009_s0 + $0xa0] sm:$0xff]   ;;  %v1289_v21 = vld [vmem:[%s2009_s0 + $0x28] sm:$0xff]  }
   0x8   :  { %32 = vst.msk [vmem:[#allocation2 + $0x60] sm:$0xff] %vm19_vm3, %v1312_v9  ;;  %33 = vst.msk [vmem:[#allocation2 + $0x68] sm:$0xff] %vm19_vm3, %v1312_v9  ;;  %v1290_v22 = vld [vmem:[%s2009_s0 + $0xa8] sm:$0xff]   ;;  %v1291_v23 = vld [vmem:[%s2009_s0 + $0x30] sm:$0xff]  }
   0x9   :  { %34 = vst.msk [vmem:[#allocation2 + $0x70] sm:$0xff] %vm19_vm3, %v1312_v9  ;;  %35 = vst.msk [vmem:[#allocation2 + $0x78] sm:$0xff] %vm19_vm3, %v1312_v9  ;;  %1208 = vmatpush3.bf16.msra.mxu0 %v480_v12  ;;  %1276 = vmatpush3.bf16.msra.mxu1 %v480_v12  ;;  %v1292_v24 = vld [vmem:[%s2009_s0 + $0xb0] sm:$0xff]   ;;  %v1293_v25 = vld [vmem:[%s2009_s0 + $0x38] sm:$0xff]  }
   0xa   :  { %36 = vst.msk [vmem:[#allocation2 + $0x80] sm:$0xff] %vm19_vm3, %v1312_v9  ;;  %37 = vst.msk [vmem:[#allocation2 + $0x88] sm:$0xff] %vm19_vm3, %v1312_v9  ;;  %v1294_v26 = vld [vmem:[%s2009_s0 + $0xb8] sm:$0xff]   ;;  %v1295_v27 = vld [vmem:[%s2009_s0 + $0x40] sm:$0xff]  }
   0xb   :  { %38 = vst.msk [vmem:[#allocation2 + $0x90] sm:$0xff] %vm19_vm3, %v1312_v9  ;;  %39 = vst.msk [vmem:[#allocation2 + $0x98] sm:$0xff] %vm19_vm3, %v1312_v9  ;;  %v1296_v28 = vld [vmem:[%s2009_s0 + $0xc0] sm:$0xff]   ;;  %v1297_v29 = vld [vmem:[%s2009_s0 + $0x48] sm:$0xff]  }
   0xc   :  { %40 = vst.msk [vmem:[#allocation2 + $0xa0] sm:$0xff] %vm19_vm3, %v1312_v9  ;;  %41 = vst.msk [vmem:[#allocation2 + $0xa8] sm:$0xff] %vm19_vm3, %v1312_v9  ;;  %1210 = vmatmul.mubr.msk.bf16.vlgmr.msra.gmra.mrb[0].mxu0 %vm378_vm2, %v1281_v13  ;;  %1242 = vmatmul.mubr.msk.bf16.vlgmr.msra.gmra.mrb[0].mxu1 %vm378_vm2, %v1282_v14  ;;  %v1298_v30 = vld [vmem:[%s2009_s0 + $0xc8] sm:$0xff]   ;;  %v1299_v31 = vld [vmem:[%s2009_s0 + $0x50] sm:$0xff]  }
   0xd   :  { %42 = vst.msk [vmem:[#allocation2 + $0xb0] sm:$0xff] %vm19_vm3, %v1312_v9  ;;  %43 = vst.msk [vmem:[#allocation2 + $0xb8] sm:$0xff] %vm19_vm3, %v1312_v9  ;;  %1213 = vmatprep.mubr.msk.bf16.mxu0 %vm378_vm2, %v1283_v15  ;;  %1245 = vmatprep.mubr.msk.bf16.mxu1 %vm378_vm2, %v1284_v16  ;;  %v1300_v32 = vld [vmem:[%s2009_s0 + $0xd0] sm:$0xff]   ;;  %v1301_v33 = vld [vmem:[%s2009_s0 + $0x58] sm:$0xff]  }
   0xe   :  { %44 = vst.msk [vmem:[#allocation2 + $0xc0] sm:$0xff] %vm19_vm3, %v1312_v9  ;;  %45 = vst.msk [vmem:[#allocation2 + $0xc8] sm:$0xff] %vm19_vm3, %v1312_v9  ;;  %v1302_v34 = vld [vmem:[%s2009_s0 + $0xd8] sm:$0xff]   ;;  %v1303_v35 = vld [vmem:[%s2009_s0 + $0x60] sm:$0xff]  }
   0xf   :  { %46 = vst.msk [vmem:[#allocation2 + $0xd0] sm:$0xff] %vm19_vm3, %v1312_v9  ;;  %47 = vst.msk [vmem:[#allocation2 + $0xd8] sm:$0xff] %vm19_vm3, %v1312_v9  ;;  %v1304_v36 = vld [vmem:[%s2009_s0 + $0xe0] sm:$0xff]   ;;  %v1305_v37 = vld [vmem:[%s2009_s0 + $0x68] sm:$0xff]  }
  0x10   :  { %48 = vst.msk [vmem:[#allocation2 + $0xe0] sm:$0xff] %vm19_vm3, %v1312_v9  ;;  %49 = vst.msk [vmem:[#allocation2 + $0xe8] sm:$0xff] %vm19_vm3, %v1312_v9  ;;  %v1306_v38 = vld [vmem:[%s2009_s0 + $0xe8] sm:$0xff]   ;;  %v1307_v39 = vld [vmem:[%s2009_s0 + $0x70] sm:$0xff]  }
  0x11   :  { %50 = vst.msk [vmem:[#allocation2 + $0xf0] sm:$0xff] %vm19_vm3, %v1312_v9  ;;  %51 = vst.msk [vmem:[#allocation2 + $0xf8] sm:$0xff] %vm19_vm3, %v1312_v9  ;;  %v1308_v40 = vld [vmem:[%s2009_s0 + $0xf0] sm:$0xff]   ;;  %v1309_v41 = vld [vmem:[%s2009_s0 + $0x78] sm:$0xff]  }
  0x12   :  { %52 = vst.msk [vmem:[#allocation2 + $0x100] sm:$0xff] %vm19_vm3, %v1312_v9  ;;  %53 = vst.msk [vmem:[#allocation2 + $0x108] sm:$0xff] %vm19_vm3, %v1312_v9  ;;  %v1310_v42 = vld [vmem:[%s2009_s0 + $0xf8] sm:$0xff]   ;;  %v86_v43 = vld [vmem:[#allocation2 + $0x10] sm:$0xff] }
  0x13   :  { %54 = vst.msk [vmem:[#allocation2 + $0x110] sm:$0xff] %vm19_vm3, %v1312_v9  ;;  %55 = vst.msk [vmem:[#allocation2 + $0x118] sm:$0xff] %vm19_vm3, %v1312_v9  ;;  %v84_v45 = vld [vmem:[#allocation2] sm:$0xff]  ;;  %v87_v49 = vld [vmem:[#allocation2 + $0x18] sm:$0xff] }
  0x14   :  { %56 = vst.msk [vmem:[#allocation2 + $0x120] sm:$0xff] %vm19_vm3, %v1312_v9  ;;  %57 = vst.msk [vmem:[#allocation2 + $0x128] sm:$0xff] %vm19_vm3, %v1312_v9  ;;  %1214 = vmatmul.mubr.msk.bf16.gmra.mrb[4].mxu0 %vm378_vm2, %v1285_v17  ;;  %1246 = vmatmul.mubr.msk.bf16.gmra.mrb[4].mxu1 %vm378_vm2, %v1286_v18  ;;  %v85_v55 = vld [vmem:[#allocation2 + $0x8] sm:$0xff]  ;;  %v90_v3 = vld [vmem:[#allocation2 + $0x30] sm:$0xff] }
  0x15   :  { %58 = vst.msk [vmem:[#allocation2 + $0x130] sm:$0xff] %vm19_vm3, %v1312_v9  ;;  %59 = vst.msk [vmem:[#allocation2 + $0x138] sm:$0xff] %vm19_vm3, %v1312_v9  ;;  %1217 = vmatprep.mubr.msk.bf16.mxu0 %vm378_vm2, %v1287_v19  ;;  %1249 = vmatprep.mubr.msk.bf16.mxu1 %vm378_vm2, %v1288_v20  ;;  %v88_v5 = vld [vmem:[#allocation2 + $0x20] sm:$0xff]  ;;  %v91_v10 = vld [vmem:[#allocation2 + $0x38] sm:$0xff] }
  0x16   :  { %60 = vst.msk [vmem:[#allocation2 + $0x140] sm:$0xff] %vm19_vm3, %v1312_v9  ;;  %61 = vst.msk [vmem:[#allocation2 + $0x148] sm:$0xff] %vm19_vm3, %v1312_v9  ;;  %v1630_v7 = vld [vmem:[%s2010_s2] ss:$0 sm:$0xff]  ;;  %v89_v16 = vld [vmem:[#allocation2 + $0x28] sm:$0xff] }
  0x17   :  { %62 = vst.msk [vmem:[#allocation2 + $0x150] sm:$0xff] %vm19_vm3, %v1312_v9  ;;  %63 = vst.msk [vmem:[#allocation2 + $0x158] sm:$0xff] %vm19_vm3, %v1312_v9 }
  0x18   :  { %64 = vst.msk [vmem:[#allocation2 + $0x160] sm:$0xff] %vm19_vm3, %v1312_v9  ;;  %65 = vst.msk [vmem:[#allocation2 + $0x168] sm:$0xff] %vm19_vm3, %v1312_v9 }
  0x19   :  { %66 = vst.msk [vmem:[#allocation2 + $0x170] sm:$0xff] %vm19_vm3, %v1312_v9  ;;  %67 = vst.msk [vmem:[#allocation2 + $0x178] sm:$0xff] %vm19_vm3, %v1312_v9  ;;  %v116_v46 = vld [vmem:[#allocation2 + $0x100] sm:$0xff]  ;;  %v117_v56 = vld [vmem:[#allocation2 + $0x108] sm:$0xff] }
  0x1a   :  { %68 = vst.msk [vmem:[#allocation2 + $0x180] sm:$0xff] %vm19_vm3, %v1312_v9  ;;  %69 = vst.msk [vmem:[#allocation2 + $0x188] sm:$0xff] %vm19_vm3, %v1312_v9  ;;  %v118_v44 = vld [vmem:[#allocation2 + $0x110] sm:$0xff]  ;;  %v119_v50 = vld [vmem:[#allocation2 + $0x118] sm:$0xff] }
  0x1b   :  { %70 = vst.msk [vmem:[#allocation2 + $0x190] sm:$0xff] %vm19_vm3, %v1312_v9  ;;  %71 = vst.msk [vmem:[#allocation2 + $0x198] sm:$0xff] %vm19_vm3, %v1312_v9  ;;  %v120_v6 = vld [vmem:[#allocation2 + $0x120] sm:$0xff]  ;;  %v121_v17 = vld [vmem:[#allocation2 + $0x128] sm:$0xff] }
  0x1c   :  { %72 = vst.msk [vmem:[#allocation2 + $0x1a0] sm:$0xff] %vm19_vm3, %v1312_v9  ;;  %73 = vst.msk [vmem:[#allocation2 + $0x1a8] sm:$0xff] %vm19_vm3, %v1312_v9  ;;  %1218 = vmatmul.mubr.msk.bf16.gmra.mrb[8].mxu0 %vm378_vm2, %v1289_v21  ;;  %1250 = vmatmul.mubr.msk.bf16.gmra.mrb[8].mxu1 %vm378_vm2, %v1290_v22  ;;  %v122_v4 = vld [vmem:[#allocation2 + $0x130] sm:$0xff]  ;;  %v123_v11 = vld [vmem:[#allocation2 + $0x138] sm:$0xff] }
  0x1d   :  { %74 = vst.msk [vmem:[#allocation2 + $0x1b0] sm:$0xff] %vm19_vm3, %v1312_v9  ;;  %75 = vst.msk [vmem:[#allocation2 + $0x1b8] sm:$0xff] %vm19_vm3, %v1312_v9  ;;  %1221 = vmatprep.mubr.msk.bf16.mxu0 %vm378_vm2, %v1291_v23  ;;  %1253 = vmatprep.mubr.msk.bf16.mxu1 %vm378_vm2, %v1292_v24 }
  0x1e   :  { %76 = vst.msk [vmem:[#allocation2 + $0x1c0] sm:$0xff] %vm19_vm3, %v1312_v9  ;;  %77 = vst.msk [vmem:[#allocation2 + $0x1c8] sm:$0xff] %vm19_vm3, %v1312_v9 }
  0x1f   :  { %78 = vst.msk [vmem:[#allocation2 + $0x1d0] sm:$0xff] %vm19_vm3, %v1312_v9  ;;  %79 = vst.msk [vmem:[#allocation2 + $0x1d8] sm:$0xff] %vm19_vm3, %v1312_v9 }
  0x20   :  { %80 = vst.msk [vmem:[#allocation2 + $0x1e0] sm:$0xff] %vm19_vm3, %v1312_v9  ;;  %81 = vst.msk [vmem:[#allocation2 + $0x1e8] sm:$0xff] %vm19_vm3, %v1312_v9 }
  0x21   :  { %82 = vst.msk [vmem:[#allocation2 + $0x1f0] sm:$0xff] %vm19_vm3, %v1312_v9  ;;  %83 = vst.msk [vmem:[#allocation2 + $0x1f8] sm:$0xff] %vm19_vm3, %v1312_v9 }
  0x24   :  { %1222 = vmatmul.mubr.msk.bf16.gmra.mrb[12].mxu0 %vm378_vm2, %v1293_v25  ;;  %1254 = vmatmul.mubr.msk.bf16.gmra.mrb[12].mxu1 %vm378_vm2, %v1294_v26 }
  0x25   :  { %1225 = vmatprep.mubr.msk.bf16.mxu0 %vm378_vm2, %v1295_v27  ;;  %1257 = vmatprep.mubr.msk.bf16.mxu1 %vm378_vm2, %v1296_v28 }
  0x2c   :  { %1226 = vmatmul.mubr.msk.bf16.gmra.mrb[16].mxu0 %vm378_vm2, %v1297_v29  ;;  %1258 = vmatmul.mubr.msk.bf16.gmra.mrb[16].mxu1 %vm378_vm2, %v1298_v30 }
  0x2d   :  { %1229 = vmatprep.mubr.msk.bf16.mxu0 %vm378_vm2, %v1299_v31  ;;  %1261 = vmatprep.mubr.msk.bf16.mxu1 %vm378_vm2, %v1300_v32 }
  0x34   :  { %1230 = vmatmul.mubr.msk.bf16.gmra.mrb[20].mxu0 %vm378_vm2, %v1301_v33  ;;  %1262 = vmatmul.mubr.msk.bf16.gmra.mrb[20].mxu1 %vm378_vm2, %v1302_v34 }
  0x35   :  { %1233 = vmatprep.mubr.msk.bf16.mxu0 %vm378_vm2, %v1303_v35  ;;  %1265 = vmatprep.mubr.msk.bf16.mxu1 %vm378_vm2, %v1304_v36 }
  0x3c   :  { %1234 = vmatmul.mubr.msk.bf16.gmra.mrb[24].mxu0 %vm378_vm2, %v1305_v37  ;;  %1266 = vmatmul.mubr.msk.bf16.gmra.mrb[24].mxu1 %vm378_vm2, %v1306_v38 }
  0x3d   :  { %1237 = vmatprep.mubr.msk.bf16.mxu0 %vm378_vm2, %v1307_v39  ;;  %1269 = vmatprep.mubr.msk.bf16.mxu1 %vm378_vm2, %v1308_v40 }
  0x44   :  { %1238 = vmatmul.mubr.msk.bf16.gmra.mrb[28].mxu0 %vm378_vm2, %v1309_v41  ;;  %1270 = vmatmul.mubr.msk.bf16.gmra.mrb[28].mxu1 %vm378_vm2, %v1310_v42 }
  0xdf   :  { %v1211_v47 = vpop.f32.mrb[0].mxu0  ;;  %v1243_v48 = vpop.f32.mrb[0].mxu1 }
  0xe0   :  { %v773_v51 = vadd.f32 %v1211_v47, %v86_v43  ;;  %v805_v52 = vadd.f32 %v1243_v48, %v118_v44  ;;  %v516_v53 = vpop.f32.mrb[1].mxu0  ;;  %v644_v54 = vpop.f32.mrb[1].mxu1  ;;  %v94_v44 = vld [vmem:[#allocation2 + $0x50] sm:$0xff]  ;;  %v124_v47 = vld [vmem:[#allocation2 + $0x140] sm:$0xff] }
  0xe1   :  { %v771_v57 = vadd.f32 %v516_v53, %v84_v45  ;;  %v803_v58 = vadd.f32 %v644_v54, %v116_v46  ;;  %v1212_v59 = vpop.f32.mrb[2].mxu0  ;;  %v1244_v60 = vpop.f32.mrb[2].mxu1  ;;  %v126_v45 = vld [vmem:[#allocation2 + $0x150] sm:$0xff]  ;;  %v92_v46 = vld [vmem:[#allocation2 + $0x40] sm:$0xff] }
  0xe2   :  { %838 = vst.msk [vmem:[#allocation2 + $0x10] sm:$0xff] %vm19_vm3, %v773_v51  ;;  %870 = vst.msk [vmem:[#allocation2 + $0x110] sm:$0xff] %vm19_vm3, %v805_v52  ;;  %v774_v61 = vadd.f32 %v1212_v59, %v87_v49  ;;  %v806_v62 = vadd.f32 %v1244_v60, %v119_v50  ;;  %v519_v63 = vpop.f32.mrb[3].mxu0  ;;  %v647_v0 = vpop.f32.mrb[3].mxu1  ;;  %v95_v50 = vld [vmem:[#allocation2 + $0x58] sm:$0xff] }
  0xe3   :  { %836 = vst.msk [vmem:[#allocation2] sm:$0xff] %vm19_vm3, %v771_v57  ;;  %868 = vst.msk [vmem:[#allocation2 + $0x100] sm:$0xff] %vm19_vm3, %v803_v58  ;;  %v772_v1 = vadd.f32 %v519_v63, %v85_v55  ;;  %v804_v2 = vadd.f32 %v647_v0, %v117_v56  ;;  %v127_v51 = vld [vmem:[#allocation2 + $0x158] sm:$0xff]  ;;  %v93_v56 = vld [vmem:[#allocation2 + $0x48] sm:$0xff] }
  0xe4   :  { %839 = vst.msk [vmem:[#allocation2 + $0x18] sm:$0xff] %vm19_vm3, %v774_v61  ;;  %871 = vst.msk [vmem:[#allocation2 + $0x118] sm:$0xff] %vm19_vm3, %v806_v62  ;;  %v125_v57 = vld [vmem:[#allocation2 + $0x148] sm:$0xff] }
  0xe5   :  { %837 = vst.msk [vmem:[#allocation2 + $0x8] sm:$0xff] %vm19_vm3, %v772_v1  ;;  %869 = vst.msk [vmem:[#allocation2 + $0x108] sm:$0xff] %vm19_vm3, %v804_v2 }
  0xe7   :  { %v1215_v8 = vpop.f32.mrb[4].mxu0  ;;  %v1247_v9 = vpop.f32.mrb[4].mxu1 }
  0xe8   :  { %v777_v12 = vadd.f32 %v1215_v8, %v90_v3  ;;  %v809_v13 = vadd.f32 %v1247_v9, %v122_v4  ;;  %v532_v14 = vpop.f32.mrb[5].mxu0  ;;  %v660_v15 = vpop.f32.mrb[5].mxu1 }
  0xe9   :  { %v905_v18 = vld [vmem:[#allocation2 + $0x10] sm:$0xff]  ;;  %v775_v20 = vadd.f32 %v532_v14, %v88_v5  ;;  %v807_v21 = vadd.f32 %v660_v15, %v120_v6  ;;  %v1216_v22 = vpop.f32.mrb[6].mxu0  ;;  %v1248_v23 = vpop.f32.mrb[6].mxu1 }
  0xea   :  { %v937_v19 = vld [vmem:[#allocation2 + $0x110] sm:$0xff]  ;;  %v976_v24 = vadd.f32 %v1630_v7, %v905_v18  ;;  %v903_v26 = vld [vmem:[#allocation2] sm:$0xff]  ;;  %842 = vst.msk [vmem:[#allocation2 + $0x30] sm:$0xff] %vm19_vm3, %v777_v12  ;;  %874 = vst.msk [vmem:[#allocation2 + $0x130] sm:$0xff] %vm19_vm3, %v809_v13  ;;  %v778_v28 = vadd.f32 %v1216_v22, %v91_v10  ;;  %v810_v29 = vadd.f32 %v1248_v23, %v123_v11  ;;  %v535_v30 = vpop.f32.mrb[7].mxu0  ;;  %v663_v31 = vpop.f32.mrb[7].mxu1 }
  0xeb   :  { %v1008_v25 = vadd.f32 %v1630_v7, %v937_v19  ;;  %v935_v27 = vld [vmem:[#allocation2 + $0x100] sm:$0xff]  ;;  %v974_v32 = vadd.f32 %v1630_v7, %v903_v26  ;;  %v906_v34 = vld [vmem:[#allocation2 + $0x18] sm:$0xff]  ;;  %840 = vst.msk [vmem:[#allocation2 + $0x20] sm:$0xff] %vm19_vm3, %v775_v20  ;;  %872 = vst.msk [vmem:[#allocation2 + $0x120] sm:$0xff] %vm19_vm3, %v807_v21  ;;  %v776_v36 = vadd.f32 %v535_v30, %v89_v16 }
  0xec   :  { %v1006_v33 = vadd.f32 %v1630_v7, %v935_v27  ;;  %v938_v35 = vld [vmem:[#allocation2 + $0x118] sm:$0xff]  ;;  %v808_v37 = vadd.f32 %v663_v31, %v121_v17  ;;  %1040 = vst.msk [vmem:[%s2011_s3 + $0x10] sm:$0xff] %vm19_vm3, %v976_v24  ;;  %v977_v38 = vadd.f32 %v1630_v7, %v906_v34  ;;  %v904_v40 = vld [vmem:[#allocation2 + $0x8] sm:$0xff]  ;;  %843 = vst.msk [vmem:[#allocation2 + $0x38] sm:$0xff] %vm19_vm3, %v778_v28 }
  0xed   :  { %1072 = vst.msk [vmem:[%s2011_s3 + $0x110] sm:$0xff] %vm19_vm3, %v1008_v25  ;;  %v1009_v39 = vadd.f32 %v1630_v7, %v938_v35  ;;  %v936_v41 = vld [vmem:[#allocation2 + $0x108] sm:$0xff]  ;;  %875 = vst.msk [vmem:[#allocation2 + $0x138] sm:$0xff] %vm19_vm3, %v810_v29  ;;  %v975_v42 = vadd.f32 %v1630_v7, %v904_v40  ;;  %v98_v21 = vld [vmem:[#allocation2 + $0x70] sm:$0xff] }
  0xee   :  { %1038 = vst.msk [vmem:[%s2011_s3] sm:$0xff] %vm19_vm3, %v974_v32  ;;  %1070 = vst.msk [vmem:[%s2011_s3 + $0x100] sm:$0xff] %vm19_vm3, %v1006_v33  ;;  %v1007_v43 = vadd.f32 %v1630_v7, %v936_v41  ;;  %v130_v22 = vld [vmem:[#allocation2 + $0x170] sm:$0xff]  ;;  %v96_v23 = vld [vmem:[#allocation2 + $0x60] sm:$0xff] }
  0xef   :  { %841 = vst.msk [vmem:[#allocation2 + $0x28] sm:$0xff] %vm19_vm3, %v776_v36  ;;  %873 = vst.msk [vmem:[#allocation2 + $0x128] sm:$0xff] %vm19_vm3, %v808_v37  ;;  %v1219_v48 = vpop.f32.mrb[8].mxu0  ;;  %v1251_v49 = vpop.f32.mrb[8].mxu1  ;;  %v128_v24 = vld [vmem:[#allocation2 + $0x160] sm:$0xff]  ;;  %v99_v27 = vld [vmem:[#allocation2 + $0x78] sm:$0xff] }
  0xf0   :  { %1041 = vst.msk [vmem:[%s2011_s3 + $0x18] sm:$0xff] %vm19_vm3, %v977_v38  ;;  %1073 = vst.msk [vmem:[%s2011_s3 + $0x118] sm:$0xff] %vm19_vm3, %v1009_v39  ;;  %v781_v52 = vadd.f32 %v1219_v48, %v94_v44  ;;  %v813_v53 = vadd.f32 %v1251_v49, %v126_v45  ;;  %v548_v54 = vpop.f32.mrb[9].mxu0  ;;  %v676_v55 = vpop.f32.mrb[9].mxu1  ;;  %v131_v28 = vld [vmem:[#allocation2 + $0x178] sm:$0xff]  ;;  %v97_v33 = vld [vmem:[#allocation2 + $0x68] sm:$0xff] }
  0xf1   :  { %1039 = vst.msk [vmem:[%s2011_s3 + $0x8] sm:$0xff] %vm19_vm3, %v975_v42  ;;  %1071 = vst.msk [vmem:[%s2011_s3 + $0x108] sm:$0xff] %vm19_vm3, %v1007_v43  ;;  %v909_v58 = vld [vmem:[#allocation2 + $0x30] sm:$0xff]  ;;  %v779_v60 = vadd.f32 %v548_v54, %v92_v46  ;;  %v811_v61 = vadd.f32 %v676_v55, %v124_v47  ;;  %v1220_v62 = vpop.f32.mrb[10].mxu0  ;;  %v1252_v63 = vpop.f32.mrb[10].mxu1  ;;  %v129_v34 = vld [vmem:[#allocation2 + $0x168] sm:$0xff] }
  0xf2   :  { %v941_v59 = vld [vmem:[#allocation2 + $0x130] sm:$0xff]  ;;  %v980_v0 = vadd.f32 %v1630_v7, %v909_v58  ;;  %v907_v2 = vld [vmem:[#allocation2 + $0x20] sm:$0xff]  ;;  %846 = vst.msk [vmem:[#allocation2 + $0x50] sm:$0xff] %vm19_vm3, %v781_v52  ;;  %878 = vst.msk [vmem:[#allocation2 + $0x150] sm:$0xff] %vm19_vm3, %v813_v53  ;;  %v782_v4 = vadd.f32 %v1220_v62, %v95_v50  ;;  %v814_v5 = vadd.f32 %v1252_v63, %v127_v51  ;;  %v551_v6 = vpop.f32.mrb[11].mxu0  ;;  %v679_v8 = vpop.f32.mrb[11].mxu1 }
  0xf3   :  { %v1012_v1 = vadd.f32 %v1630_v7, %v941_v59  ;;  %v939_v3 = vld [vmem:[#allocation2 + $0x120] sm:$0xff]  ;;  %v978_v9 = vadd.f32 %v1630_v7, %v907_v2  ;;  %v910_v11 = vld [vmem:[#allocation2 + $0x38] sm:$0xff]  ;;  %844 = vst.msk [vmem:[#allocation2 + $0x40] sm:$0xff] %vm19_vm3, %v779_v60  ;;  %876 = vst.msk [vmem:[#allocation2 + $0x140] sm:$0xff] %vm19_vm3, %v811_v61  ;;  %v780_v13 = vadd.f32 %v551_v6, %v93_v56 }
  0xf4   :  { %v1010_v10 = vadd.f32 %v1630_v7, %v939_v3  ;;  %v942_v12 = vld [vmem:[#allocation2 + $0x138] sm:$0xff]  ;;  %v812_v14 = vadd.f32 %v679_v8, %v125_v57  ;;  %1044 = vst.msk [vmem:[%s2011_s3 + $0x30] sm:$0xff] %vm19_vm3, %v980_v0  ;;  %v981_v15 = vadd.f32 %v1630_v7, %v910_v11  ;;  %847 = vst.msk [vmem:[#allocation2 + $0x58] sm:$0xff] %vm19_vm3, %v782_v4  ;;  %v102_v61 = vld [vmem:[#allocation2 + $0x90] sm:$0xff] }
  0xf5   :  { %1076 = vst.msk [vmem:[%s2011_s3 + $0x130] sm:$0xff] %vm19_vm3, %v1012_v1  ;;  %v1013_v16 = vadd.f32 %v1630_v7, %v942_v12  ;;  %879 = vst.msk [vmem:[#allocation2 + $0x158] sm:$0xff] %vm19_vm3, %v814_v5  ;;  %v134_v62 = vld [vmem:[#allocation2 + $0x190] sm:$0xff]  ;;  %v100_v63 = vld [vmem:[#allocation2 + $0x80] sm:$0xff] }
  0xf6   :  { %v908_v17 = vld [vmem:[#allocation2 + $0x28] sm:$0xff]  ;;  %1042 = vst.msk [vmem:[%s2011_s3 + $0x20] sm:$0xff] %vm19_vm3, %v978_v9  ;;  %1074 = vst.msk [vmem:[%s2011_s3 + $0x120] sm:$0xff] %vm19_vm3, %v1010_v10  ;;  %v132_v0 = vld [vmem:[#allocation2 + $0x180] sm:$0xff] }
  0xf7   :  { %v940_v18 = vld [vmem:[#allocation2 + $0x128] sm:$0xff]  ;;  %v979_v19 = vadd.f32 %v1630_v7, %v908_v17  ;;  %845 = vst.msk [vmem:[#allocation2 + $0x48] sm:$0xff] %vm19_vm3, %v780_v13  ;;  %877 = vst.msk [vmem:[#allocation2 + $0x148] sm:$0xff] %vm19_vm3, %v812_v14  ;;  %v1223_v25 = vpop.f32.mrb[12].mxu0  ;;  %v1255_v26 = vpop.f32.mrb[12].mxu1  ;;  %v103_v3 = vld [vmem:[#allocation2 + $0x98] sm:$0xff] }
  0xf8   :  { %v1011_v20 = vadd.f32 %v1630_v7, %v940_v18  ;;  %1045 = vst.msk [vmem:[%s2011_s3 + $0x38] sm:$0xff] %vm19_vm3, %v981_v15  ;;  %1077 = vst.msk [vmem:[%s2011_s3 + $0x138] sm:$0xff] %vm19_vm3, %v1013_v16  ;;  %v785_v29 = vadd.f32 %v1223_v25, %v98_v21  ;;  %v817_v30 = vadd.f32 %v1255_v26, %v130_v22  ;;  %v564_v31 = vpop.f32.mrb[13].mxu0  ;;  %v692_v32 = vpop.f32.mrb[13].mxu1  ;;  %v135_v4 = vld [vmem:[#allocation2 + $0x198] sm:$0xff]  ;;  %v101_v10 = vld [vmem:[#allocation2 + $0x88] sm:$0xff] }
  0xf9   :  { %1043 = vst.msk [vmem:[%s2011_s3 + $0x28] sm:$0xff] %vm19_vm3, %v979_v19  ;;  %v913_v35 = vld [vmem:[#allocation2 + $0x50] sm:$0xff]  ;;  %v783_v37 = vadd.f32 %v564_v31, %v96_v23  ;;  %v815_v38 = vadd.f32 %v692_v32, %v128_v24  ;;  %v1224_v39 = vpop.f32.mrb[14].mxu0  ;;  %v1256_v40 = vpop.f32.mrb[14].mxu1  ;;  %v133_v11 = vld [vmem:[#allocation2 + $0x188] sm:$0xff] }
  0xfa   :  { %1075 = vst.msk [vmem:[%s2011_s3 + $0x128] sm:$0xff] %vm19_vm3, %v1011_v20  ;;  %v945_v36 = vld [vmem:[#allocation2 + $0x150] sm:$0xff]  ;;  %v984_v41 = vadd.f32 %v1630_v7, %v913_v35  ;;  %v911_v43 = vld [vmem:[#allocation2 + $0x40] sm:$0xff]  ;;  %850 = vst.msk [vmem:[#allocation2 + $0x70] sm:$0xff] %vm19_vm3, %v785_v29  ;;  %v786_v45 = vadd.f32 %v1224_v39, %v99_v27  ;;  %v818_v46 = vadd.f32 %v1256_v40, %v131_v28  ;;  %v567_v47 = vpop.f32.mrb[15].mxu0  ;;  %v695_v48 = vpop.f32.mrb[15].mxu1 }
  0xfb   :  { %v1016_v42 = vadd.f32 %v1630_v7, %v945_v36  ;;  %v943_v44 = vld [vmem:[#allocation2 + $0x140] sm:$0xff]  ;;  %882 = vst.msk [vmem:[#allocation2 + $0x170] sm:$0xff] %vm19_vm3, %v817_v30  ;;  %v982_v49 = vadd.f32 %v1630_v7, %v911_v43  ;;  %v914_v51 = vld [vmem:[#allocation2 + $0x58] sm:$0xff]  ;;  %848 = vst.msk [vmem:[#allocation2 + $0x60] sm:$0xff] %vm19_vm3, %v783_v37  ;;  %v784_v53 = vadd.f32 %v567_v47, %v97_v33 }
  0xfc   :  { %v1014_v50 = vadd.f32 %v1630_v7, %v943_v44  ;;  %v946_v52 = vld [vmem:[#allocation2 + $0x158] sm:$0xff]  ;;  %880 = vst.msk [vmem:[#allocation2 + $0x160] sm:$0xff] %vm19_vm3, %v815_v38  ;;  %v816_v54 = vadd.f32 %v695_v48, %v129_v34  ;;  %1048 = vst.msk [vmem:[%s2011_s3 + $0x50] sm:$0xff] %vm19_vm3, %v984_v41  ;;  %v985_v55 = vadd.f32 %v1630_v7, %v914_v51  ;;  %v106_v38 = vld [vmem:[#allocation2 + $0xb0] sm:$0xff] }
  0xfd   :  { %1080 = vst.msk [vmem:[%s2011_s3 + $0x150] sm:$0xff] %vm19_vm3, %v1016_v42  ;;  %v1017_v56 = vadd.f32 %v1630_v7, %v946_v52  ;;  %851 = vst.msk [vmem:[#allocation2 + $0x78] sm:$0xff] %vm19_vm3, %v786_v45  ;;  %v138_v39 = vld [vmem:[#allocation2 + $0x1b0] sm:$0xff]  ;;  %v104_v40 = vld [vmem:[#allocation2 + $0xa0] sm:$0xff] }
  0xfe   :  { %v912_v57 = vld [vmem:[#allocation2 + $0x48] sm:$0xff]  ;;  %883 = vst.msk [vmem:[#allocation2 + $0x178] sm:$0xff] %vm19_vm3, %v818_v46  ;;  %1046 = vst.msk [vmem:[%s2011_s3 + $0x40] sm:$0xff] %vm19_vm3, %v982_v49  ;;  %v136_v41 = vld [vmem:[#allocation2 + $0x1a0] sm:$0xff] }
  0xff   :  { %v944_v58 = vld [vmem:[#allocation2 + $0x148] sm:$0xff]  ;;  %1078 = vst.msk [vmem:[%s2011_s3 + $0x140] sm:$0xff] %vm19_vm3, %v1014_v50  ;;  %v983_v59 = vadd.f32 %v1630_v7, %v912_v57  ;;  %849 = vst.msk [vmem:[#allocation2 + $0x68] sm:$0xff] %vm19_vm3, %v784_v53  ;;  %v1227_v1 = vpop.f32.mrb[16].mxu0  ;;  %v1259_v2 = vpop.f32.mrb[16].mxu1  ;;  %v107_v44 = vld [vmem:[#allocation2 + $0xb8] sm:$0xff] }
 0x100   :  { %v1015_v60 = vadd.f32 %v1630_v7, %v944_v58  ;;  %881 = vst.msk [vmem:[#allocation2 + $0x168] sm:$0xff] %vm19_vm3, %v816_v54  ;;  %1049 = vst.msk [vmem:[%s2011_s3 + $0x58] sm:$0xff] %vm19_vm3, %v985_v55  ;;  %v789_v5 = vadd.f32 %v1227_v1, %v102_v61  ;;  %v821_v6 = vadd.f32 %v1259_v2, %v134_v62  ;;  %v580_v8 = vpop.f32.mrb[17].mxu0  ;;  %v708_v9 = vpop.f32.mrb[17].mxu1  ;;  %v139_v45 = vld [vmem:[#allocation2 + $0x1b8] sm:$0xff]  ;;  %v105_v50 = vld [vmem:[#allocation2 + $0xa8] sm:$0xff] }
 0x101   :  { %1081 = vst.msk [vmem:[%s2011_s3 + $0x158] sm:$0xff] %vm19_vm3, %v1017_v56  ;;  %1047 = vst.msk [vmem:[%s2011_s3 + $0x48] sm:$0xff] %vm19_vm3, %v983_v59  ;;  %v917_v12 = vld [vmem:[#allocation2 + $0x70] sm:$0xff]  ;;  %v787_v14 = vadd.f32 %v580_v8, %v100_v63  ;;  %v819_v15 = vadd.f32 %v708_v9, %v132_v0  ;;  %v1228_v16 = vpop.f32.mrb[18].mxu0  ;;  %v1260_v17 = vpop.f32.mrb[18].mxu1  ;;  %v137_v51 = vld [vmem:[#allocation2 + $0x1a8] sm:$0xff] }
 0x102   :  { %1079 = vst.msk [vmem:[%s2011_s3 + $0x148] sm:$0xff] %vm19_vm3, %v1015_v60  ;;  %v949_v13 = vld [vmem:[#allocation2 + $0x170] sm:$0xff]  ;;  %v988_v18 = vadd.f32 %v1630_v7, %v917_v12  ;;  %v915_v20 = vld [vmem:[#allocation2 + $0x60] sm:$0xff]  ;;  %854 = vst.msk [vmem:[#allocation2 + $0x90] sm:$0xff] %vm19_vm3, %v789_v5  ;;  %v790_v22 = vadd.f32 %v1228_v16, %v103_v3  ;;  %v822_v23 = vadd.f32 %v1260_v17, %v135_v4  ;;  %v583_v24 = vpop.f32.mrb[19].mxu0  ;;  %v711_v25 = vpop.f32.mrb[19].mxu1 }
 0x103   :  { %v1020_v19 = vadd.f32 %v1630_v7, %v949_v13  ;;  %v947_v21 = vld [vmem:[#allocation2 + $0x160] sm:$0xff]  ;;  %886 = vst.msk [vmem:[#allocation2 + $0x190] sm:$0xff] %vm19_vm3, %v821_v6  ;;  %v986_v26 = vadd.f32 %v1630_v7, %v915_v20  ;;  %852 = vst.msk [vmem:[#allocation2 + $0x80] sm:$0xff] %vm19_vm3, %v787_v14  ;;  %v788_v30 = vadd.f32 %v583_v24, %v101_v10  ;;  %v142_v16 = vld [vmem:[#allocation2 + $0x1d0] sm:$0xff] }
 0x104   :  { %v1018_v27 = vadd.f32 %v1630_v7, %v947_v21  ;;  %v918_v28 = vld [vmem:[#allocation2 + $0x78] sm:$0xff]  ;;  %884 = vst.msk [vmem:[#allocation2 + $0x180] sm:$0xff] %vm19_vm3, %v819_v15  ;;  %v820_v31 = vadd.f32 %v711_v25, %v133_v11  ;;  %1052 = vst.msk [vmem:[%s2011_s3 + $0x70] sm:$0xff] %vm19_vm3, %v988_v18  ;;  %v110_v15 = vld [vmem:[#allocation2 + $0xd0] sm:$0xff] }
 0x105   :  { %v950_v29 = vld [vmem:[#allocation2 + $0x178] sm:$0xff]  ;;  %1084 = vst.msk [vmem:[%s2011_s3 + $0x170] sm:$0xff] %vm19_vm3, %v1020_v19  ;;  %v989_v32 = vadd.f32 %v1630_v7, %v918_v28  ;;  %855 = vst.msk [vmem:[#allocation2 + $0x98] sm:$0xff] %vm19_vm3, %v790_v22  ;;  %v108_v17 = vld [vmem:[#allocation2 + $0xc0] sm:$0xff] }
 0x106   :  { %v1021_v33 = vadd.f32 %v1630_v7, %v950_v29  ;;  %v916_v34 = vld [vmem:[#allocation2 + $0x68] sm:$0xff]  ;;  %887 = vst.msk [vmem:[#allocation2 + $0x198] sm:$0xff] %vm19_vm3, %v822_v23  ;;  %1050 = vst.msk [vmem:[%s2011_s3 + $0x60] sm:$0xff] %vm19_vm3, %v986_v26  ;;  %v140_v18 = vld [vmem:[#allocation2 + $0x1c0] sm:$0xff] }
 0x107   :  { %v948_v35 = vld [vmem:[#allocation2 + $0x168] sm:$0xff]  ;;  %1082 = vst.msk [vmem:[%s2011_s3 + $0x160] sm:$0xff] %vm19_vm3, %v1018_v27  ;;  %v987_v36 = vadd.f32 %v1630_v7, %v916_v34  ;;  %853 = vst.msk [vmem:[#allocation2 + $0x88] sm:$0xff] %vm19_vm3, %v788_v30  ;;  %v1231_v42 = vpop.f32.mrb[20].mxu0  ;;  %v1263_v43 = vpop.f32.mrb[20].mxu1  ;;  %v111_v21 = vld [vmem:[#allocation2 + $0xd8] sm:$0xff] }
 0x108   :  { %v1019_v37 = vadd.f32 %v1630_v7, %v948_v35  ;;  %885 = vst.msk [vmem:[#allocation2 + $0x188] sm:$0xff] %vm19_vm3, %v820_v31  ;;  %1053 = vst.msk [vmem:[%s2011_s3 + $0x78] sm:$0xff] %vm19_vm3, %v989_v32  ;;  %v793_v46 = vadd.f32 %v1231_v42, %v106_v38  ;;  %v825_v47 = vadd.f32 %v1263_v43, %v138_v39  ;;  %v596_v48 = vpop.f32.mrb[21].mxu0  ;;  %v724_v49 = vpop.f32.mrb[21].mxu1  ;;  %v143_v22 = vld [vmem:[#allocation2 + $0x1d8] sm:$0xff]  ;;  %v109_v27 = vld [vmem:[#allocation2 + $0xc8] sm:$0xff] }
 0x109   :  { %1085 = vst.msk [vmem:[%s2011_s3 + $0x178] sm:$0xff] %vm19_vm3, %v1021_v33  ;;  %1051 = vst.msk [vmem:[%s2011_s3 + $0x68] sm:$0xff] %vm19_vm3, %v987_v36  ;;  %v921_v52 = vld [vmem:[#allocation2 + $0x90] sm:$0xff]  ;;  %v791_v54 = vadd.f32 %v596_v48, %v104_v40  ;;  %v823_v55 = vadd.f32 %v724_v49, %v136_v41  ;;  %v1232_v56 = vpop.f32.mrb[22].mxu0  ;;  %v1264_v57 = vpop.f32.mrb[22].mxu1  ;;  %v141_v28 = vld [vmem:[#allocation2 + $0x1c8] sm:$0xff] }
 0x10a   :  { %1083 = vst.msk [vmem:[%s2011_s3 + $0x168] sm:$0xff] %vm19_vm3, %v1019_v37  ;;  %v953_v53 = vld [vmem:[#allocation2 + $0x190] sm:$0xff]  ;;  %v992_v58 = vadd.f32 %v1630_v7, %v921_v52  ;;  %v919_v60 = vld [vmem:[#allocation2 + $0x80] sm:$0xff]  ;;  %858 = vst.msk [vmem:[#allocation2 + $0xb0] sm:$0xff] %vm19_vm3, %v793_v46  ;;  %v794_v62 = vadd.f32 %v1232_v56, %v107_v44  ;;  %v826_v63 = vadd.f32 %v1264_v57, %v139_v45  ;;  %v599_v0 = vpop.f32.mrb[23].mxu0  ;;  %v727_v1 = vpop.f32.mrb[23].mxu1 }
 0x10b   :  { %v1024_v59 = vadd.f32 %v1630_v7, %v953_v53  ;;  %v951_v61 = vld [vmem:[#allocation2 + $0x180] sm:$0xff]  ;;  %890 = vst.msk [vmem:[#allocation2 + $0x1b0] sm:$0xff] %vm19_vm3, %v825_v47  ;;  %v990_v2 = vadd.f32 %v1630_v7, %v919_v60  ;;  %856 = vst.msk [vmem:[#allocation2 + $0xa0] sm:$0xff] %vm19_vm3, %v791_v54  ;;  %v792_v6 = vadd.f32 %v599_v0, %v105_v50  ;;  %v146_v56 = vld [vmem:[#allocation2 + $0x1f0] sm:$0xff] }
 0x10c   :  { %v1022_v3 = vadd.f32 %v1630_v7, %v951_v61  ;;  %v922_v4 = vld [vmem:[#allocation2 + $0x98] sm:$0xff]  ;;  %888 = vst.msk [vmem:[#allocation2 + $0x1a0] sm:$0xff] %vm19_vm3, %v823_v55  ;;  %v824_v8 = vadd.f32 %v727_v1, %v137_v51  ;;  %1056 = vst.msk [vmem:[%s2011_s3 + $0x90] sm:$0xff] %vm19_vm3, %v992_v58  ;;  %v114_v55 = vld [vmem:[#allocation2 + $0xf0] sm:$0xff] }
 0x10d   :  { %v954_v5 = vld [vmem:[#allocation2 + $0x198] sm:$0xff]  ;;  %1088 = vst.msk [vmem:[%s2011_s3 + $0x190] sm:$0xff] %vm19_vm3, %v1024_v59  ;;  %v993_v9 = vadd.f32 %v1630_v7, %v922_v4  ;;  %859 = vst.msk [vmem:[#allocation2 + $0xb8] sm:$0xff] %vm19_vm3, %v794_v62  ;;  %v112_v57 = vld [vmem:[#allocation2 + $0xe0] sm:$0xff] }
 0x10e   :  { %v1025_v10 = vadd.f32 %v1630_v7, %v954_v5  ;;  %v920_v11 = vld [vmem:[#allocation2 + $0x88] sm:$0xff]  ;;  %891 = vst.msk [vmem:[#allocation2 + $0x1b8] sm:$0xff] %vm19_vm3, %v826_v63  ;;  %1054 = vst.msk [vmem:[%s2011_s3 + $0x80] sm:$0xff] %vm19_vm3, %v990_v2  ;;  %v144_v58 = vld [vmem:[#allocation2 + $0x1e0] sm:$0xff] }
 0x10f   :  { %v952_v12 = vld [vmem:[#allocation2 + $0x188] sm:$0xff]  ;;  %1086 = vst.msk [vmem:[%s2011_s3 + $0x180] sm:$0xff] %vm19_vm3, %v1022_v3  ;;  %v991_v13 = vadd.f32 %v1630_v7, %v920_v11  ;;  %857 = vst.msk [vmem:[#allocation2 + $0xa8] sm:$0xff] %vm19_vm3, %v792_v6  ;;  %v1235_v19 = vpop.f32.mrb[24].mxu0  ;;  %v1267_v20 = vpop.f32.mrb[24].mxu1  ;;  %v115_v61 = vld [vmem:[#allocation2 + $0xf8] sm:$0xff] }
 0x110   :  { %v1023_v14 = vadd.f32 %v1630_v7, %v952_v12  ;;  %889 = vst.msk [vmem:[#allocation2 + $0x1a8] sm:$0xff] %vm19_vm3, %v824_v8  ;;  %1057 = vst.msk [vmem:[%s2011_s3 + $0x98] sm:$0xff] %vm19_vm3, %v993_v9  ;;  %v797_v23 = vadd.f32 %v1235_v19, %v110_v15  ;;  %v829_v24 = vadd.f32 %v1267_v20, %v142_v16  ;;  %v612_v25 = vpop.f32.mrb[25].mxu0  ;;  %v740_v26 = vpop.f32.mrb[25].mxu1  ;;  %v147_v62 = vld [vmem:[#allocation2 + $0x1f8] sm:$0xff]  ;;  %v113_v3 = vld [vmem:[#allocation2 + $0xe8] sm:$0xff] }
 0x111   :  { %1089 = vst.msk [vmem:[%s2011_s3 + $0x198] sm:$0xff] %vm19_vm3, %v1025_v10  ;;  %1055 = vst.msk [vmem:[%s2011_s3 + $0x88] sm:$0xff] %vm19_vm3, %v991_v13  ;;  %v925_v29 = vld [vmem:[#allocation2 + $0xb0] sm:$0xff]  ;;  %v795_v31 = vadd.f32 %v612_v25, %v108_v17  ;;  %v827_v32 = vadd.f32 %v740_v26, %v140_v18  ;;  %v1236_v33 = vpop.f32.mrb[26].mxu0  ;;  %v1268_v34 = vpop.f32.mrb[26].mxu1  ;;  %v145_v4 = vld [vmem:[#allocation2 + $0x1e8] sm:$0xff] }
 0x112   :  { %1087 = vst.msk [vmem:[%s2011_s3 + $0x188] sm:$0xff] %vm19_vm3, %v1023_v14  ;;  %v957_v30 = vld [vmem:[#allocation2 + $0x1b0] sm:$0xff]  ;;  %v996_v35 = vadd.f32 %v1630_v7, %v925_v29  ;;  %v923_v37 = vld [vmem:[#allocation2 + $0xa0] sm:$0xff]  ;;  %862 = vst.msk [vmem:[#allocation2 + $0xd0] sm:$0xff] %vm19_vm3, %v797_v23  ;;  %v798_v39 = vadd.f32 %v1236_v33, %v111_v21  ;;  %v830_v40 = vadd.f32 %v1268_v34, %v143_v22  ;;  %v615_v41 = vpop.f32.mrb[27].mxu0  ;;  %v743_v42 = vpop.f32.mrb[27].mxu1 }
 0x113   :  { %v1028_v36 = vadd.f32 %v1630_v7, %v957_v30  ;;  %v955_v38 = vld [vmem:[#allocation2 + $0x1a0] sm:$0xff]  ;;  %894 = vst.msk [vmem:[#allocation2 + $0x1d0] sm:$0xff] %vm19_vm3, %v829_v24  ;;  %v994_v43 = vadd.f32 %v1630_v7, %v923_v37  ;;  %860 = vst.msk [vmem:[#allocation2 + $0xc0] sm:$0xff] %vm19_vm3, %v795_v31  ;;  %v796_v47 = vadd.f32 %v615_v41, %v109_v27 }
 0x114   :  { %v1026_v44 = vadd.f32 %v1630_v7, %v955_v38  ;;  %v926_v45 = vld [vmem:[#allocation2 + $0xb8] sm:$0xff]  ;;  %892 = vst.msk [vmem:[#allocation2 + $0x1c0] sm:$0xff] %vm19_vm3, %v827_v32  ;;  %v828_v48 = vadd.f32 %v743_v42, %v141_v28  ;;  %1060 = vst.msk [vmem:[%s2011_s3 + $0xb0] sm:$0xff] %vm19_vm3, %v996_v35 }
 0x115   :  { %v958_v46 = vld [vmem:[#allocation2 + $0x1b8] sm:$0xff]  ;;  %1092 = vst.msk [vmem:[%s2011_s3 + $0x1b0] sm:$0xff] %vm19_vm3, %v1028_v36  ;;  %v997_v49 = vadd.f32 %v1630_v7, %v926_v45  ;;  %863 = vst.msk [vmem:[#allocation2 + $0xd8] sm:$0xff] %vm19_vm3, %v798_v39 }
 0x116   :  { %v1029_v50 = vadd.f32 %v1630_v7, %v958_v46  ;;  %v924_v51 = vld [vmem:[#allocation2 + $0xa8] sm:$0xff]  ;;  %895 = vst.msk [vmem:[#allocation2 + $0x1d8] sm:$0xff] %vm19_vm3, %v830_v40  ;;  %1058 = vst.msk [vmem:[%s2011_s3 + $0xa0] sm:$0xff] %vm19_vm3, %v994_v43 }
 0x117   :  { %v956_v52 = vld [vmem:[#allocation2 + $0x1a8] sm:$0xff]  ;;  %1090 = vst.msk [vmem:[%s2011_s3 + $0x1a0] sm:$0xff] %vm19_vm3, %v1026_v44  ;;  %v995_v53 = vadd.f32 %v1630_v7, %v924_v51  ;;  %861 = vst.msk [vmem:[#allocation2 + $0xc8] sm:$0xff] %vm19_vm3, %v796_v47  ;;  %v1239_v59 = vpop.f32.mrb[28].mxu0  ;;  %v1271_v60 = vpop.f32.mrb[28].mxu1 }
 0x118   :  { %v1027_v54 = vadd.f32 %v1630_v7, %v956_v52  ;;  %893 = vst.msk [vmem:[#allocation2 + $0x1c8] sm:$0xff] %vm19_vm3, %v828_v48  ;;  %1061 = vst.msk [vmem:[%s2011_s3 + $0xb8] sm:$0xff] %vm19_vm3, %v997_v49  ;;  %v801_v63 = vadd.f32 %v1239_v59, %v114_v55  ;;  %v833_v0 = vadd.f32 %v1271_v60, %v146_v56  ;;  %v628_v1 = vpop.f32.mrb[29].mxu0  ;;  %v756_v2 = vpop.f32.mrb[29].mxu1 }
 0x119   :  { %1093 = vst.msk [vmem:[%s2011_s3 + $0x1b8] sm:$0xff] %vm19_vm3, %v1029_v50  ;;  %1059 = vst.msk [vmem:[%s2011_s3 + $0xa8] sm:$0xff] %vm19_vm3, %v995_v53  ;;  %v929_v5 = vld [vmem:[#allocation2 + $0xd0] sm:$0xff]  ;;  %v799_v8 = vadd.f32 %v628_v1, %v112_v57  ;;  %v831_v9 = vadd.f32 %v756_v2, %v144_v58  ;;  %v1240_v10 = vpop.f32.mrb[30].mxu0  ;;  %v1272_v11 = vpop.f32.mrb[30].mxu1 }
 0x11a   :  { %1091 = vst.msk [vmem:[%s2011_s3 + $0x1a8] sm:$0xff] %vm19_vm3, %v1027_v54  ;;  %v961_v6 = vld [vmem:[#allocation2 + $0x1d0] sm:$0xff]  ;;  %v1000_v12 = vadd.f32 %v1630_v7, %v929_v5  ;;  %v927_v14 = vld [vmem:[#allocation2 + $0xc0] sm:$0xff]  ;;  %866 = vst.msk [vmem:[#allocation2 + $0xf0] sm:$0xff] %vm19_vm3, %v801_v63  ;;  %v802_v16 = vadd.f32 %v1240_v10, %v115_v61  ;;  %v834_v17 = vadd.f32 %v1272_v11, %v147_v62  ;;  %v631_v18 = vpop.f32.mrb[31].mxu0  ;;  %v759_v19 = vpop.f32.mrb[31].mxu1 }
 0x11b   :  { %v1032_v13 = vadd.f32 %v1630_v7, %v961_v6  ;;  %v959_v15 = vld [vmem:[#allocation2 + $0x1c0] sm:$0xff]  ;;  %898 = vst.msk [vmem:[#allocation2 + $0x1f0] sm:$0xff] %vm19_vm3, %v833_v0  ;;  %v998_v20 = vadd.f32 %v1630_v7, %v927_v14  ;;  %864 = vst.msk [vmem:[#allocation2 + $0xe0] sm:$0xff] %vm19_vm3, %v799_v8  ;;  %v800_v24 = vadd.f32 %v631_v18, %v113_v3 }
 0x11c   :  { %v1030_v21 = vadd.f32 %v1630_v7, %v959_v15  ;;  %v930_v22 = vld [vmem:[#allocation2 + $0xd8] sm:$0xff]  ;;  %896 = vst.msk [vmem:[#allocation2 + $0x1e0] sm:$0xff] %vm19_vm3, %v831_v9  ;;  %v832_v25 = vadd.f32 %v759_v19, %v145_v4  ;;  %1064 = vst.msk [vmem:[%s2011_s3 + $0xd0] sm:$0xff] %vm19_vm3, %v1000_v12 }
 0x11d   :  { %v962_v23 = vld [vmem:[#allocation2 + $0x1d8] sm:$0xff]  ;;  %1096 = vst.msk [vmem:[%s2011_s3 + $0x1d0] sm:$0xff] %vm19_vm3, %v1032_v13  ;;  %v1001_v26 = vadd.f32 %v1630_v7, %v930_v22  ;;  %867 = vst.msk [vmem:[#allocation2 + $0xf8] sm:$0xff] %vm19_vm3, %v802_v16 }
 0x11e   :  { %v1033_v27 = vadd.f32 %v1630_v7, %v962_v23  ;;  %v928_v28 = vld [vmem:[#allocation2 + $0xc8] sm:$0xff]  ;;  %899 = vst.msk [vmem:[#allocation2 + $0x1f8] sm:$0xff] %vm19_vm3, %v834_v17  ;;  %1062 = vst.msk [vmem:[%s2011_s3 + $0xc0] sm:$0xff] %vm19_vm3, %v998_v20 }
 0x11f   :  { %v960_v29 = vld [vmem:[#allocation2 + $0x1c8] sm:$0xff]  ;;  %1094 = vst.msk [vmem:[%s2011_s3 + $0x1c0] sm:$0xff] %vm19_vm3, %v1030_v21  ;;  %v999_v30 = vadd.f32 %v1630_v7, %v928_v28  ;;  %865 = vst.msk [vmem:[#allocation2 + $0xe8] sm:$0xff] %vm19_vm3, %v800_v24 }
 0x120   :  { %v1031_v31 = vadd.f32 %v1630_v7, %v960_v29  ;;  %897 = vst.msk [vmem:[#allocation2 + $0x1e8] sm:$0xff] %vm19_vm3, %v832_v25  ;;  %1065 = vst.msk [vmem:[%s2011_s3 + $0xd8] sm:$0xff] %vm19_vm3, %v1001_v26 }
 0x121   :  { %1097 = vst.msk [vmem:[%s2011_s3 + $0x1d8] sm:$0xff] %vm19_vm3, %v1033_v27  ;;  %1063 = vst.msk [vmem:[%s2011_s3 + $0xc8] sm:$0xff] %vm19_vm3, %v999_v30  ;;  %v933_v32 = vld [vmem:[#allocation2 + $0xf0] sm:$0xff] }
 0x122   :  { %1095 = vst.msk [vmem:[%s2011_s3 + $0x1c8] sm:$0xff] %vm19_vm3, %v1031_v31  ;;  %v965_v33 = vld [vmem:[#allocation2 + $0x1f0] sm:$0xff]  ;;  %v1004_v34 = vadd.f32 %v1630_v7, %v933_v32  ;;  %v931_v36 = vld [vmem:[#allocation2 + $0xe0] sm:$0xff] }
 0x123   :  { %v1036_v35 = vadd.f32 %v1630_v7, %v965_v33  ;;  %v963_v37 = vld [vmem:[#allocation2 + $0x1e0] sm:$0xff]  ;;  %v1002_v38 = vadd.f32 %v1630_v7, %v931_v36 }
 0x124   :  { %v1034_v39 = vadd.f32 %v1630_v7, %v963_v37  ;;  %v934_v40 = vld [vmem:[#allocation2 + $0xf8] sm:$0xff]  ;;  %1068 = vst.msk [vmem:[%s2011_s3 + $0xf0] sm:$0xff] %vm19_vm3, %v1004_v34 }
 0x125   :  { %v966_v41 = vld [vmem:[#allocation2 + $0x1f8] sm:$0xff]  ;;  %1100 = vst.msk [vmem:[%s2011_s3 + $0x1f0] sm:$0xff] %vm19_vm3, %v1036_v35  ;;  %v1005_v42 = vadd.f32 %v1630_v7, %v934_v40  ;;  %1066 = vst.msk [vmem:[%s2011_s3 + $0xe0] sm:$0xff] %vm19_vm3, %v1002_v38 }
 0x126   :  { %v1037_v43 = vadd.f32 %v1630_v7, %v966_v41  ;;  %v932_v44 = vld [vmem:[#allocation2 + $0xe8] sm:$0xff]  ;;  %1098 = vst.msk [vmem:[%s2011_s3 + $0x1e0] sm:$0xff] %vm19_vm3, %v1034_v39 }
 0x127   :  { %v964_v45 = vld [vmem:[#allocation2 + $0x1e8] sm:$0xff]  ;;  %v1003_v46 = vadd.f32 %v1630_v7, %v932_v44  ;;  %1069 = vst.msk [vmem:[%s2011_s3 + $0xf8] sm:$0xff] %vm19_vm3, %v1005_v42 }
 0x128   :  { %v1035_v47 = vadd.f32 %v1630_v7, %v964_v45  ;;  %1101 = vst.msk [vmem:[%s2011_s3 + $0x1f8] sm:$0xff] %vm19_vm3, %v1037_v43 }
 0x129   :  { %1067 = vst.msk [vmem:[%s2011_s3 + $0xe8] sm:$0xff] %vm19_vm3, %v1003_v46 }
 0x12a   :  { %1099 = vst.msk [vmem:[%s2011_s3 + $0x1e8] sm:$0xff] %vm19_vm3, %v1035_v47 }

</bundles_post_ra>
